<compile_context>
chip_gen: v7x
topology: tpu7x:2x2x1
jax: 0.10.0
libtpu: 0.0.40
codegen_flags: <defaults>
</compile_context>

<pallas_src>
import math

import jax
import jax.numpy as jnp
import numpy as np
from jax.experimental import pallas as pl
from jax.experimental.pallas import tpu as pltpu


def _make_dchr_kernel(TB, Rig, Ro, F, inv_area, fuse_fill):
    """Kernel over one batch-block: matmul-pool + scatter into channel band."""

    def kernel(x_ref, m_ref, o_ref):
        # x_ref: (TB*Rig, K)  m_ref: (K, No)  o_ref: (TB*Ro, No)
        acc = jnp.dot(x_ref[...], m_ref[...], preferred_element_type=jnp.float32)
        pooled = (acc * inv_area).astype(o_ref.dtype)  # exact 0/1 M, scale in f32
        if fuse_fill:
            # Zero the whole block (VMEM-only stores, ~free); pooled band
            # below overwrites its rows.  This is how the zero "fill"
            # channels reach HBM without a separate concat pass.
            o_ref[...] = jnp.zeros_like(o_ref)
        for b in range(TB):  # static unroll: per-batch-item row scatter
            r0 = b * Ro + F
            o_ref[r0:r0 + Rig, :] = pooled[b * Rig:(b + 1) * Rig, :]

    return kernel


def dchr_forward(x, stride):
    """Pallas implementation of DCHR.forward for NCHW float input x."""
    N, C, H, W = x.shape
    s = int(stride)
    assert jnp.issubdtype(x.dtype, jnp.floating), "DCHR expects float input"
    Ho, Wo = H // s, W // s
    assert Ho > 0 and Wo > 0, "stride larger than spatial dims"
    # AvgPool2d truncates trailing rows/cols that don't fill a window.
    if H != Ho * s or W != Wo * s:
        x = x[:, :, :Ho * s, :Wo * s]
        H, W = Ho * s, Wo * s

    c_half = C // 2
    C_out = C + 2 * c_half
    itemsize = x.dtype.itemsize

    # ---- choose g: raw (c, ho) pooled rows folded into one matmul row.
    # Must divide gcd(c_half*Ho, C*Ho) so channel-band boundaries align with
    # matmul-row boundaries (keeps every reshape free).  Prefer the smallest
    # g with g*Wo an exact multiple of 128 (unmasked lane-dense stores),
    # else the smallest with g*Wo >= 128, else the widest available.
    G0 = math.gcd(c_half * Ho, C * Ho)
    divs = [d for d in range(1, G0 + 1) if G0 % d == 0]
    m_cap = 4 << 20  # cap pooling-matrix bytes (VMEM on v7x, MXU redundancy)

    def _m_bytes(d):
        return (d * s * W) * (d * Wo) * itemsize

    c1 = [d for d in divs if (d * Wo) % 128 == 0 and d * Wo <= 512 and _m_bytes(d) <= m_cap]
    c2 = [d for d in divs if d * Wo >= 128 and d * Wo <= 512 and _m_bytes(d) <= m_cap]
    c3 = [d for d in divs if _m_bytes(d) <= m_cap]
    g = min(c1) if c1 else (min(c2) if c2 else (max(c3) if c3 else 1))

    K = g * s * W          # contraction dim (full last dim of the x view)
    No = g * Wo            # output lanes per matmul row
    Rig = (C * Ho) // g    # pooled (input) matmul rows per batch item
    Ro = (C_out * Ho) // g  # output matmul rows per batch item (incl. fill)
    F = (c_half * Ho) // g  # fill rows before the pooled band per batch item

    # ---- exact {0,1} block-diagonal pooling matrix (scale applied in-kernel).
    cols = np.arange(s * W) % W
    m0 = (cols[:, None] // s == np.arange(Wo)[None, :]).astype(np.float32)  # (s*W, Wo)
    m = jnp.asarray(np.kron(np.eye(g, dtype=np.float32), m0), dtype=x.dtype)  # (K, No)

    # Free (contiguous) reshapes: channels+rows folded into matmul rows.
    x_view = x.reshape(N * Rig, K)

    # ---- batch-block size TB (TB | N; grid steps = N // TB).
    per_item_bytes = (Rig * K + Ro * No) * itemsize
    target_bytes = 3 << 20                      # ~3 MiB in+out per grid step
    divs_n = [t for t in range(1, N + 1) if N % t == 0]

    def _legal(t):  # (8,128) rule: sublane count multiple of 8, or full extent
        return t == N or ((t * Rig) % 8 == 0 and (t * Ro) % 8 == 0)

    tb_cap = N if N == 1 else max(1, N // 2)    # >=2 steps when N>=2 (v7x 2 TCs)
    mem_cap = max(1, target_bytes // max(per_item_bytes, 1))
    cand = [t for t in divs_n if _legal(t) and t <= min(tb_cap, mem_cap, 128)]
    if cand:
        TB = max(cand)
    else:
        legal = [t for t in divs_n if _legal(t) and t <= 128]
        TB = min(legal) if legal else N
    num_blocks = N // TB

    kernel = _make_dchr_kernel(TB, Rig, Ro, F, 1.0 / float(s * s),
                               fuse_fill=(C_out != C))

    out_flat = pl.pallas_call(
        kernel,
        out_shape=jax.ShapeDtypeStruct((N * Ro, No), x.dtype),
        grid_spec=pltpu.PrefetchScalarGridSpec(
            num_scalar_prefetch=0,
            grid=(num_blocks,),
            in_specs=[
                pl.BlockSpec((TB * Rig, K), lambda b: (b, 0)),
                pl.BlockSpec((K, No), lambda b: (0, 0)),   # constant -> fetched once
            ],
            out_specs=pl.BlockSpec((TB * Ro, No), lambda b: (b, 0)),
        ),
        compiler_params=pltpu.CompilerParams(
            dimension_semantics=("parallel",),  # disjoint rows per step; lets
        ),                                      # v7x shard across 2 TCs
    )(x_view, m)

    return out_flat.reshape(N, C_out, Ho, Wo)   # free reshape back to NCHW


def dchr_reference(x, stride):
    """Pure-JAX reference matching the PyTorch module semantics."""
    N, C, H, W = x.shape
    Ho, Wo = H // stride, W // stride
    xc = x[:, :, :Ho * stride, :Wo * stride]
    pooled = xc.reshape(N, C, Ho, stride, Wo, stride).mean(axis=(3, 5))
    fill = jnp.zeros((N, C // 2, Ho, Wo), x.dtype)
    return jnp.concatenate([fill, pooled, fill], axis=1)


if __name__ == "__main__":
    key = jax.random.PRNGKey(0)
    configs = [
        ((2, 4, 16, 16), 2),   # main shape: lane-dense No = 128 path
        ((2, 6, 16, 16), 2),   # No not a multiple of 128 (masked-store path)
        ((2, 5, 16, 16), 4),   # odd channel count, larger stride
    ]
    for shape, stride in configs:
        key, sub = jax.random.split(key)
        x = jax.random.normal(sub, shape, dtype=jnp.float32)
        out = jax.block_until_ready(dchr_forward(x, stride))
        ref = dchr_reference(x, stride)
        assert out.shape == ref.shape, (shape, stride, out.shape, ref.shape)
        assert jnp.allclose(out, ref, atol=1e-5, rtol=1e-5), (shape, stride)
    print("KERNEL_OK")
</pallas_src>

<mosaic_0001>
module attributes {stable_mosaic.version = 11 : i64} {
  func.func @kernel(%arg0: i32, %arg1: memref<4x512xf32, #tpu.memory_space<vmem>>, %arg2: memref<512x128xf32, #tpu.memory_space<vmem>>, %arg3: memref<8x128xf32, #tpu.memory_space<vmem>>) attributes {dimension_semantics = [#tpu.dimension_semantics<parallel>], iteration_bounds = array<i64: 1>, scalar_prefetch = 0 : i64, scratch_operands = 0 : i64, tpu.core_type = #tpu.core_type<tc>, window_params = [{transform_indices = @transform_0, window_bounds = array<i64: 4, 512>}, {pipeline_mode = #tpu.pipeline_mode<synchronous>, transform_indices = @transform_1, window_bounds = array<i64: 512, 128>}, {transform_indices = @transform_2, window_bounds = array<i64: 8, 128>}]} {
    %c0 = arith.constant 0 : index
    %c0_0 = arith.constant 0 : index
    %0 = vector.load %arg1[%c0, %c0_0] : memref<4x512xf32, #tpu.memory_space<vmem>>, vector<4x512xf32>
    %c0_1 = arith.constant 0 : index
    %c0_2 = arith.constant 0 : index
    %1 = vector.load %arg2[%c0_1, %c0_2] : memref<512x128xf32, #tpu.memory_space<vmem>>, vector<512x128xf32>
    %cst = arith.constant dense<0.000000e+00> : vector<4x128xf32>
    %2 = tpu.matmul %0, %1, %cst {dimension_numbers = #tpu.dot_dimension_numbers<[1], [0], [0], [1], [0, 0, 1, 1], [], []>} : vector<4x512xf32>, vector<512x128xf32>, vector<4x128xf32> -> vector<4x128xf32>
    %cst_3 = arith.constant 2.500000e-01 : f32
    %3 = vector.broadcast %cst_3 : f32 to vector<4x128xf32>
    %4 = arith.mulf %2, %3 : vector<4x128xf32>
    %cst_4 = arith.constant 0.000000e+00 : f32
    %5 = vector.broadcast %cst_4 : f32 to vector<8x128xf32>
    %c0_5 = arith.constant 0 : index
    %c0_6 = arith.constant 0 : index
    %6 = vector.load %arg3[%c0_5, %c0_6] : memref<8x128xf32, #tpu.memory_space<vmem>>, vector<8x128xf32>
    tpu.vector_store %arg3[%c0_5, %c0_6], %5 {strides = array<i32>} : memref<8x128xf32, #tpu.memory_space<vmem>>, vector<8x128xf32>,
    %7 = vector.extract_strided_slice %4 {offsets = [0, 0], sizes = [2, 128], strides = [1, 1]} : vector<4x128xf32> to vector<2x128xf32>
    %c1 = arith.constant 1 : index
    %c0_7 = arith.constant 0 : index
    %8 = vector.load %arg3[%c1, %c0_7] : memref<8x128xf32, #tpu.memory_space<vmem>>, vector<2x128xf32>
    tpu.vector_store %arg3[%c1, %c0_7], %7 {strides = array<i32>} : memref<8x128xf32, #tpu.memory_space<vmem>>, vector<2x128xf32>,
    %9 = vector.extract_strided_slice %4 {offsets = [2, 0], sizes = [2, 128], strides = [1, 1]} : vector<4x128xf32> to vector<2x128xf32>
    %c5 = arith.constant 5 : index
    %c0_8 = arith.constant 0 : index
    %10 = vector.load %arg3[%c5, %c0_8] : memref<8x128xf32, #tpu.memory_space<vmem>>, vector<2x128xf32>
    tpu.vector_store %arg3[%c5, %c0_8], %9 {strides = array<i32>} : memref<8x128xf32, #tpu.memory_space<vmem>>, vector<2x128xf32>,
    return
  }
  func.func @transform_0(%arg0: i32) -> (i32, i32) {
    %c0_i32 = arith.constant 0 : i32
    %c0_i32_0 = arith.constant 0 : i32
    return %arg0, %c0_i32 : i32, i32
  }
  func.func @transform_1(%arg0: i32) -> (i32, i32) {
    %c0_i32 = arith.constant 0 : i32
    %c0_i32_0 = arith.constant 0 : i32
    %c0_i32_1 = arith.constant 0 : i32
    return %c0_i32, %c0_i32_0 : i32, i32
  }
  func.func @transform_2(%arg0: i32) -> (i32, i32) {
    %c0_i32 = arith.constant 0 : i32
    %c0_i32_0 = arith.constant 0 : i32
    return %arg0, %c0_i32 : i32, i32
  }
}

</mosaic_0001>

<bundles_post_ra>
// kernel: tpu_custom_call.1
= control target key start
LH: loop header
LB: loop body
LE: loop exit
PB: predicated region body
PF: predicated region fallthrough
CT: control target
= control target key end

     0   :  { %7 = vsyncpa [#allocation3], 0  ;;  %s548_s0 = inlined_call_operand.hbm [shape: f32[4,512], index: 0, kind: input, shape index: {}]   ;;  %s549_s1 = inlined_call_operand.hbm [shape: f32[512,128], index: 1, kind: input, shape index: {}]   ;;  %s550_s2 = inlined_call_operand.hbm [shape: f32[8,128], index: 2, kind: output, shape index: {}]  }
   0x1   :  { %8 = vsyncpa [#allocation6], 0 }
   0x2   :  { %9 = vsyncpa [#allocation4], 0  ;;  %s484_s9 = smov [#allocation2]   ;;  %s485_s11 = smov [#allocation5]  }
   0x3   :  { %s16_s10 = sshll.u32 %s484_s9, 4  ;;  %s25_s12 = sshll.u32 %s485_s11, 4  ;;  %s17_s10 = int_to_ptr.vmem [resolvable:$true] %s16_s10  ;;  %s505_s12 = int_to_ptr.vmem [resolvable:$true] %s25_s12 }
   0x4   :  { %s412_s15 = scalar_lea.hbm %s548_s0, 256 }
   0x5   :  { %p413_p0 = scmp.ne.s32.totalorder %s548_s0, %s412_s15  ;;  %p416_p1 = scmp.lt.u32.totalorder %s412_s15, %s548_s0 }
   0x7   :  { %p418_p2 = pnand %p416_p1, %p413_p0 }
   0x9   :  { %421 = shalt.err (!%p418_p2)
}
   0xa   :  { %s422_s20 = scalar_lea.vmem %s17_s10, 256  ;;  %p427_p4 = scmp.lt.s32.totalorder %s17_s10, %s17_s10 }
   0xb   :  { %p423_p3 = scmp.ne.s32.totalorder %s17_s10, %s422_s20  ;;  %p428_p5 = scmp.lt.s32.totalorder %s422_s20, %s422_s20 }
   0xd   :  { %p429_p6 = por %p428_p5, %p427_p4 }
   0xf   :  { %p430_p7 = pnand %p429_p6, %p423_p3 }
  0x11   :  { %433 = shalt.err (!%p430_p7)
}
  0x12   :  { %19 = dma.hbm_to_vmem [thread:$0]  %s548_s0, 256, %s17_s10, [#allocation3]  }
  0x13   :  { %s434_s25 = scalar_lea.hbm %s549_s1, 8192 }
  0x14   :  { %p435_p8 = scmp.ne.s32.totalorder %s549_s1, %s434_s25  ;;  %p438_p9 = scmp.lt.u32.totalorder %s434_s25, %s549_s1 }
  0x16   :  { %p440_p10 = pnand %p438_p9, %p435_p8 }
  0x18   :  { %443 = shalt.err (!%p440_p10)
}
  0x19   :  { %s444_s30 = scalar_lea.vmem %s505_s12, 8192  ;;  %p449_p12 = scmp.lt.s32.totalorder %s505_s12, %s505_s12 }
  0x1a   :  { %p445_p11 = scmp.ne.s32.totalorder %s505_s12, %s444_s30  ;;  %p450_p13 = scmp.lt.s32.totalorder %s444_s30, %s444_s30 }
  0x1c   :  { %p451_p0 = por %p450_p13, %p449_p12 }
  0x1e   :  { %p452_p1 = pnand %p451_p0, %p445_p11 }
  0x20   :  { %455 = shalt.err (!%p452_p1)
}
  0x21   :  { %s486_s0 = smov 128   ;;  %s487_s3 = smov 8  }
  0x22   :  { %31 = dma.hbm_to_vmem [thread:$0]  %s549_s1, 8192, %s505_s12, [#allocation6], %s486_s0, %s486_s0, %s487_s3  }
  0x23   :  { %478 = dma.done.wait [#allocation3], 256  }
  0x24   :  { %479 = vsyncadd [#allocation3], 4294967040 }
  0x25   :  { %480 = dma.done.wait [#allocation6], 8192  }
  0x26   :  { %481 = vsyncadd [#allocation6], 4294959104  ;;  %v56_v0 = vld [vmem:[#allocation5 + $0x80] sm:$0xff]  ;;  %v57_v1 = vld [vmem:[#allocation5 + $0x88] sm:$0xff]  ;;  %s489_s1 = smov [#allocation7]  }
  0x27   :  { %v88_v2 = vld [vmem:[#allocation5 + $0x180] sm:$0xff]  ;;  %v340_v3 = vpack.c.bf16 %v57_v1, %v56_v0  ;;  %v89_v4 = vld [vmem:[#allocation5 + $0x188] sm:$0xff]  ;;  %v58_v11 = vld [vmem:[#allocation5 + $0x90] sm:$0xff]  ;;  %s260_s6 = sshll.u32 %s489_s1, 4  ;;  %s261_s6 = int_to_ptr.vmem [resolvable:$true] %s260_s6 }
  0x28   :  { %v40_v5 = vld [vmem:[#allocation5] sm:$0xff]  ;;  %v41_v6 = vld [vmem:[#allocation5 + $0x8] sm:$0xff]  ;;  %v372_v7 = vpack.c.bf16 %v89_v4, %v88_v2  ;;  %v59_v13 = vld [vmem:[#allocation5 + $0x98] sm:$0xff]  ;;  %s456_s7 = scalar_lea.vmem %s261_s6, 128  ;;  %p461_p3 = scmp.lt.s32.totalorder %s261_s6, %s261_s6 }
  0x29   :  { %v342_v8 = vpack.c.bf16 %v41_v6, %v40_v5  ;;  %v72_v9 = vld [vmem:[#allocation5 + $0x100] sm:$0xff]  ;;  %v73_v10 = vld [vmem:[#allocation5 + $0x108] sm:$0xff]  ;;  %341 = vmatprep.subr.bf16.mxu0 %v340_v3  ;;  %v90_v14 = vld [vmem:[#allocation5 + $0x190] sm:$0xff]  ;;  %v344_v16 = vpack.c.bf16 %v59_v13, %v58_v11  ;;  %p457_p2 = scmp.ne.s32.totalorder %s261_s6, %s456_s7  ;;  %p462_p4 = scmp.lt.s32.totalorder %s456_s7, %s456_s7 }
  0x2a   :  { %v374_v12 = vpack.c.bf16 %v73_v10, %v72_v9  ;;  %v91_v15 = vld [vmem:[#allocation5 + $0x198] sm:$0xff]  ;;  %373 = vmatprep.subr.bf16.mxu1 %v372_v7  ;;  %v42_v18 = vld [vmem:[#allocation5 + $0x10] sm:$0xff]  ;;  %v60_v23 = vld [vmem:[#allocation5 + $0xa0] sm:$0xff] }
  0x2b   :  { %343 = vmatpush3.bf16.msra.mxu0 %v342_v8  ;;  %v376_v17 = vpack.c.bf16 %v91_v15, %v90_v14  ;;  %v43_v19 = vld [vmem:[#allocation5 + $0x18] sm:$0xff]  ;;  %v74_v20 = vld [vmem:[#allocation5 + $0x110] sm:$0xff]  ;;  %v61_v24 = vld [vmem:[#allocation5 + $0xa8] sm:$0xff]  ;;  %p463_p5 = por %p462_p4, %p461_p3 }
  0x2c   :  { %375 = vmatpush3.bf16.msra.mxu1 %v374_v12  ;;  %v346_v21 = vpack.c.bf16 %v43_v19, %v42_v18  ;;  %v75_v22 = vld [vmem:[#allocation5 + $0x118] sm:$0xff]  ;;  %345 = vmatprep.subr.bf16.mxu0 %v344_v16  ;;  %v348_v26 = vpack.c.bf16 %v61_v24, %v60_v23  ;;  %v92_v27 = vld [vmem:[#allocation5 + $0x1a0] sm:$0xff]  ;;  %v93_v28 = vld [vmem:[#allocation5 + $0x1a8] sm:$0xff] }
  0x2d   :  { %377 = vmatprep.subr.bf16.mxu1 %v376_v17  ;;  %v378_v25 = vpack.c.bf16 %v75_v22, %v74_v20  ;;  %v44_v29 = vld [vmem:[#allocation5 + $0x20] sm:$0xff]  ;;  %v380_v30 = vpack.c.bf16 %v93_v28, %v92_v27  ;;  %v45_v31 = vld [vmem:[#allocation5 + $0x28] sm:$0xff]  ;;  %v62_v35 = vld [vmem:[#allocation5 + $0xb0] sm:$0xff]  ;;  %p464_p6 = pnand %p463_p5, %p457_p2 }
  0x2e   :  { %v76_v32 = vld [vmem:[#allocation5 + $0x120] sm:$0xff]  ;;  %v77_v33 = vld [vmem:[#allocation5 + $0x128] sm:$0xff]  ;;  %v350_v34 = vpack.c.bf16 %v45_v31, %v44_v29  ;;  %v63_v36 = vld [vmem:[#allocation5 + $0xb8] sm:$0xff] }
  0x2f   :  { %347 = vmatpush3.bf16.msra.mxu0 %v346_v21  ;;  %v94_v37 = vld [vmem:[#allocation5 + $0x1b0] sm:$0xff]  ;;  %v382_v38 = vpack.c.bf16 %v77_v33, %v76_v32  ;;  %v352_v39 = vpack.c.bf16 %v63_v36, %v62_v35  ;;  %v95_v40 = vld [vmem:[#allocation5 + $0x1b8] sm:$0xff]  ;;  %v64_v46 = vld [vmem:[#allocation5 + $0xc0] sm:$0xff]  ;;  %v488_v36 = vmov 0.0  }
  0x30   :  { %379 = vmatpush3.bf16.msra.mxu1 %v378_v25  ;;  %349 = vmatprep.subr.bf16.mxu0 %v348_v26  ;;  %v46_v41 = vld [vmem:[#allocation5 + $0x30] sm:$0xff]  ;;  %v47_v42 = vld [vmem:[#allocation5 + $0x38] sm:$0xff]  ;;  %v384_v43 = vpack.c.bf16 %v95_v40, %v94_v37  ;;  %v65_v47 = vld [vmem:[#allocation5 + $0xc8] sm:$0xff]  ;;  %251 = vst [vmem:[#allocation7] sm:$0xff] %v488_v36 }
  0x31   :  { %381 = vmatprep.subr.bf16.mxu1 %v380_v30  ;;  %v78_v44 = vld [vmem:[#allocation5 + $0x130] sm:$0xff]  ;;  %v79_v45 = vld [vmem:[#allocation5 + $0x138] sm:$0xff]  ;;  %v96_v48 = vld [vmem:[#allocation5 + $0x1c0] sm:$0xff]  ;;  %v354_v50 = vpack.c.bf16 %v47_v42, %v46_v41  ;;  %v356_v52 = vpack.c.bf16 %v65_v47, %v64_v46 }
  0x32   :  { %v97_v49 = vld [vmem:[#allocation5 + $0x1c8] sm:$0xff]  ;;  %v386_v51 = vpack.c.bf16 %v79_v45, %v78_v44  ;;  %v48_v53 = vld [vmem:[#allocation5 + $0x40] sm:$0xff]  ;;  %v66_v58 = vld [vmem:[#allocation5 + $0xd0] sm:$0xff] }
  0x33   :  { %351 = vmatpush3.bf16.msra.mxu0 %v350_v34  ;;  %v49_v54 = vld [vmem:[#allocation5 + $0x48] sm:$0xff]  ;;  %v80_v55 = vld [vmem:[#allocation5 + $0x140] sm:$0xff]  ;;  %v388_v56 = vpack.c.bf16 %v97_v49, %v96_v48  ;;  %v67_v59 = vld [vmem:[#allocation5 + $0xd8] sm:$0xff] }
  0x34   :  { %383 = vmatpush3.bf16.msra.mxu1 %v382_v38  ;;  %353 = vmatprep.subr.bf16.mxu0 %v352_v39  ;;  %v81_v57 = vld [vmem:[#allocation5 + $0x148] sm:$0xff]  ;;  %v98_v60 = vld [vmem:[#allocation5 + $0x1d0] sm:$0xff]  ;;  %v99_v61 = vld [vmem:[#allocation5 + $0x1d8] sm:$0xff]  ;;  %v358_v62 = vpack.c.bf16 %v49_v54, %v48_v53  ;;  %v360_v0 = vpack.c.bf16 %v67_v59, %v66_v58 }
  0x35   :  { %385 = vmatprep.subr.bf16.mxu1 %v384_v43  ;;  %v390_v63 = vpack.c.bf16 %v81_v57, %v80_v55  ;;  %v50_v1 = vld [vmem:[#allocation5 + $0x50] sm:$0xff]  ;;  %v51_v2 = vld [vmem:[#allocation5 + $0x58] sm:$0xff]  ;;  %v392_v4 = vpack.c.bf16 %v99_v61, %v98_v60  ;;  %v68_v6 = vld [vmem:[#allocation5 + $0xe0] sm:$0xff] }
  0x36   :  { %v82_v3 = vld [vmem:[#allocation5 + $0x150] sm:$0xff]  ;;  %v83_v5 = vld [vmem:[#allocation5 + $0x158] sm:$0xff]  ;;  %v69_v7 = vld [vmem:[#allocation5 + $0xe8] sm:$0xff]  ;;  %v362_v10 = vpack.c.bf16 %v51_v2, %v50_v1 }
  0x37   :  { %355 = vmatpush3.bf16.msra.mxu0 %v354_v50  ;;  %v100_v8 = vld [vmem:[#allocation5 + $0x1e0] sm:$0xff]  ;;  %v101_v9 = vld [vmem:[#allocation5 + $0x1e8] sm:$0xff]  ;;  %v394_v13 = vpack.c.bf16 %v83_v5, %v82_v3  ;;  %v364_v14 = vpack.c.bf16 %v69_v7, %v68_v6  ;;  %v38_v16 = vld [vmem:[#allocation2] sm:$0xff] }
  0x38   :  { %387 = vmatpush3.bf16.msra.mxu1 %v386_v51  ;;  %357 = vmatprep.subr.bf16.mxu0 %v356_v52  ;;  %v52_v11 = vld [vmem:[#allocation5 + $0x60] sm:$0xff]  ;;  %v53_v12 = vld [vmem:[#allocation5 + $0x68] sm:$0xff]  ;;  %v39_v17 = vld [vmem:[#allocation2 + $0x8] sm:$0xff]  ;;  %v396_v18 = vpack.c.bf16 %v101_v9, %v100_v8  ;;  %v106_v22 = vcombine.high %v38_v16, %v38_v16 }
  0x39   :  { %389 = vmatprep.subr.bf16.mxu1 %v388_v56  ;;  %v84_v15 = vld [vmem:[#allocation5 + $0x160] sm:$0xff]  ;;  %v85_v19 = vld [vmem:[#allocation5 + $0x168] sm:$0xff]  ;;  %v70_v20 = vld [vmem:[#allocation5 + $0xf0] sm:$0xff]  ;;  %v107_v23 = vcombine.high %v39_v17, %v39_v17  ;;  %v366_v26 = vpack.c.bf16 %v53_v12, %v52_v11 }
  0x3a   :  { %v71_v21 = vld [vmem:[#allocation5 + $0xf8] sm:$0xff]  ;;  %v102_v24 = vld [vmem:[#allocation5 + $0x1f0] sm:$0xff]  ;;  %174 = vmatprep.mubr.f32.mxu0 %v106_v22  ;;  %v398_v27 = vpack.c.bf16 %v85_v19, %v84_v15 }
  0x3b   :  { %359 = vmatpush3.bf16.msra.mxu0 %v358_v62  ;;  %v103_v25 = vld [vmem:[#allocation5 + $0x1f8] sm:$0xff]  ;;  %v368_v28 = vpack.c.bf16 %v71_v21, %v70_v20  ;;  %v54_v29 = vld [vmem:[#allocation5 + $0x70] sm:$0xff]  ;;  %244 = vmatprep.mubr.f32.mxu1 %v107_v23 }
  0x3c   :  { %391 = vmatpush3.bf16.msra.mxu1 %v390_v63  ;;  %361 = vmatprep.subr.bf16.mxu0 %v360_v0  ;;  %v55_v30 = vld [vmem:[#allocation5 + $0x78] sm:$0xff]  ;;  %v400_v31 = vpack.c.bf16 %v103_v25, %v102_v24  ;;  %v86_v32 = vld [vmem:[#allocation5 + $0x170] sm:$0xff] }
  0x3d   :  { %393 = vmatprep.subr.bf16.mxu1 %v392_v4  ;;  %v87_v33 = vld [vmem:[#allocation5 + $0x178] sm:$0xff]  ;;  %v370_v34 = vpack.c.bf16 %v55_v30, %v54_v29 }
  0x3e   :  { %v402_v35 = vpack.c.bf16 %v87_v33, %v86_v32 }
  0x3f   :  { %363 = vmatpush3.bf16.msra.mxu0 %v362_v10 }
  0x40   :  { %395 = vmatpush3.bf16.msra.mxu1 %v394_v13  ;;  %365 = vmatprep.subr.bf16.mxu0 %v364_v14 }
  0x41   :  { %397 = vmatprep.subr.bf16.mxu1 %v396_v18 }
  0x43   :  { %367 = vmatpush3.bf16.msra.mxu0 %v366_v26 }
  0x44   :  { %399 = vmatpush3.bf16.msra.mxu1 %v398_v27  ;;  %369 = vmatprep.subr.bf16.mxu0 %v368_v28 }
  0x45   :  { %401 = vmatprep.subr.bf16.mxu1 %v400_v31 }
  0x47   :  { %371 = vmatpush3.bf16.msra.mxu0 %v370_v34 }
  0x48   :  { %403 = vmatpush3.bf16.msra.mxu1 %v402_v35 }
  0x4a   :  { %175 = vmatmul.mubr.f32.vlgmr.msra.gmra.mrb[0].mxu0 %v38_v16 }
  0x4b   :  { %245 = vmatmul.mubr.f32.vlgmr.msra.gmra.mrb[0].mxu1 %v39_v17 }
 0x11d   :  { %v302_v37 = vpop.f32.mrb[0].mxu0 }
 0x11e   :  { %v337_v38 = vpop.f32.mrb[0].mxu1  ;;  %v303_v39 = vpop.f32.mrb[1].mxu0 }
 0x11f   :  { %v304_v40 = vadd.f32 %v303_v39, %v302_v37  ;;  %v338_v41 = vpop.f32.mrb[1].mxu1 }
 0x120   :  { %v339_v42 = vadd.f32 %v338_v41, %v337_v38 }
 0x122   :  { %v247_v43 = vadd.f32 %v339_v42, %v304_v40 }
 0x124   :  { %v250_v44 = vmul.f32 0.25, %v247_v43 }
 0x126   :  { %252 = vst [vmem:[#allocation7 + $0x1] sm:$0x3] %v250_v44  ;;  %253 = vst [vmem:[#allocation7 + $0x3] sm:$0xc] %v250_v44 }
 0x127   :  { %467 = shalt.err (!%p464_p6)
}
 0x128   :  { %s468_s10 = scalar_lea.hbm %s550_s2, 128 }
 0x129   :  { %p469_p7 = scmp.ne.s32.totalorder %s550_s2, %s468_s10  ;;  %p472_p8 = scmp.lt.u32.totalorder %s468_s10, %s550_s2 }
 0x12b   :  { %p474_p9 = pnand %p472_p8, %p469_p7 }
 0x12d   :  { %477 = shalt.err (!%p474_p9)
}
 0x12e   :  { %263 = dma.vmem_to_hbm [thread:$0]  %s261_s6, 128, %s550_s2, [#allocation4]  }
 0x12f   :  { %482 = dma.done.wait [#allocation4], 128  }
 0x130   :  { %483 = vsyncadd [#allocation4], 4294967168 }
 0x131   :  { %267 = vsyncpa [#allocation3], 1 }
 0x132   :  { %268 = vsyncpa [#allocation6], 1 }
 0x133   :  { %269 = vsyncpa [#allocation4], 1 }

</bundles_post_ra>
